<compile_context>
chip_gen: v7x
topology: tpu7x:2x2x1
jax: 0.10.0
libtpu: 0.0.40
codegen_flags: <defaults>
</compile_context>

<pallas_src>
import functools
from typing import NamedTuple

import numpy as np

import jax
import jax.numpy as jnp
from jax.experimental import pallas as pl
from jax.experimental.pallas import tpu as pltpu


# ----------------------------------------------------------------------------
# NF4 quantize -> dequantize simulation (parameter setup, plain JAX)
# ----------------------------------------------------------------------------
_NF4_CODEBOOK = jnp.array(
    [
        -1.0, -0.6961928009986877, -0.5250730514526367, -0.39491748809814453,
        -0.28444138169288635, -0.18477343022823334, -0.09105003625154495, 0.0,
        0.07958029955625534, 0.16093020141124725, 0.24611230194568634,
        0.33791524171829224, 0.44070982933044434, 0.5626170039176941,
        0.7229568362236023, 1.0,
    ],
    dtype=jnp.float32,
)


def nf4_quant_dequant(w, block_size=64):
    """Blockwise NF4 quantization followed by dequantization (bnb-style)."""
    orig_shape = w.shape
    flat = w.astype(jnp.float32).reshape(-1, block_size)
    absmax = jnp.max(jnp.abs(flat), axis=1, keepdims=True)
    safe_absmax = jnp.where(absmax == 0.0, 1.0, absmax)
    normed = flat / safe_absmax
    codes = jnp.argmin(
        jnp.abs(normed[..., None] - _NF4_CODEBOOK[None, None, :]), axis=-1
    )
    deq = _NF4_CODEBOOK[codes] * absmax
    return deq.reshape(orig_shape).astype(w.dtype)


# ----------------------------------------------------------------------------
# Small helpers
# ----------------------------------------------------------------------------
def _round_up(x, m):
    return ((x + m - 1) // m) * m


def _cdiv(a, b):
    return -(-a // b)


def _default_vmem_limit():
    """Pick a scoped-VMEM limit appropriate for the local chip generation."""
    cap = 64 << 20
    try:
        info = pltpu.get_tpu_info()
        cap = int(getattr(info, "vmem_capacity_bytes", cap))
    except Exception:
        pass
    if cap >= (128 << 20):          # v5e / v6e: 128 MiB physical VMEM
        return 100 << 20
    # v7x: 64 MiB physical -> leave headroom for Mosaic internal scratch.
    return max(32 << 20, cap - (12 << 20))


def _tile_footprint_bytes(tm, th, D_pad, R_pad, w_bytes, x_bytes, out_bytes):
    """Estimate VMEM use: 2x-buffered blocks + f32/compute scratch."""
    dbl = 2 * (
        tm * D_pad * x_bytes        # x tile
        + tm * D_pad * out_bytes    # out tile
        + D_pad * th * w_bytes      # W_up tile
        + th * D_pad * w_bytes      # W_down tile
        + R_pad * th * w_bytes      # B_up tile
        + th * R_pad * w_bytes      # A_down tile
        + D_pad * R_pad * w_bytes   # A_up (constant index, still 2 buffers)
        + R_pad * D_pad * w_bytes   # B_down (constant index, still 2 buffers)
    )
    scratch = tm * R_pad * w_bytes + tm * R_pad * 4 + tm * D_pad * 4
    return dbl + scratch


def _choose_tile_h(H, D_pad, R_pad, tm, w_bytes, x_bytes, out_bytes, budget):
    """Largest H tile (multiple of 128) that fits the VMEM budget.

    If the full H fits, the weights become VMEM-resident across M tiles
    (constant block index => no per-M-tile HBM re-streaming).  Otherwise the
    tile count is balanced to minimize H over-padding.
    """
    lanes_full = _round_up(H, 128) // 128
    lanes = lanes_full
    while lanes > 1 and _tile_footprint_bytes(
            tm, lanes * 128, D_pad, R_pad, w_bytes, x_bytes, out_bytes) > budget:
        lanes = _cdiv(lanes, 2)
    nh = _cdiv(lanes_full, lanes)
    lanes = _cdiv(lanes_full, nh)       # balance tiles -> minimal over-padding
    return lanes * 128, lanes * 128 * nh


def _apply_activation(y, name):
    if name == "relu":
        return jnp.maximum(y, 0.0)
    if name == "silu":
        return y * (1.0 / (1.0 + jnp.exp(-y)))
    if name == "gelu":
        c = 0.7978845608028654  # sqrt(2/pi), tanh approximation
        return 0.5 * y * (1.0 + jnp.tanh(c * (y + 0.044715 * y * y * y)))
    raise ValueError(f"unsupported activation: {name}")


# ----------------------------------------------------------------------------
# Parameter preparation (pad + cast ONCE, not per forward call)
# ----------------------------------------------------------------------------
class MLPParams(NamedTuple):
    wup: jax.Array    # (D_pad, H_pad)  dequantized up-proj, compute dtype
    aup: jax.Array    # (D_pad, R_pad)  LoRA A (up)
    bup: jax.Array    # (R_pad, H_pad)  LoRA B (up)
    wdn: jax.Array    # (H_pad, D_pad)  dequantized down-proj
    adn: jax.Array    # (H_pad, R_pad)  LoRA A (down)
    bdn: jax.Array    # (R_pad, D_pad)  LoRA B (down)
    d: int
    h: int
    r: int
    tile_h: int
    vmem_limit: int


def prepare_mlp_params(
    w_up_deq_t,        # [D, H]
    w_up_lora_a,       # [D, R]
    w_up_lora_b,       # [R, H]
    w_down_deq_t,      # [H, D]
    w_down_lora_a,     # [H, R]
    w_down_lora_b,     # [R, D]
    compute_dtype=jnp.bfloat16,
    tile_m=512,
    tile_h=None,
    vmem_limit_bytes=None,
):
    D, H = w_up_deq_t.shape
    R = w_up_lora_a.shape[1]
    D_pad = _round_up(D, 128)
    R_pad = _round_up(R, 128)

    vmem_limit = int(vmem_limit_bytes) if vmem_limit_bytes else _default_vmem_limit()
    budget = vmem_limit - (4 << 20)     # headroom for semaphores / internals
    w_bytes = jnp.dtype(compute_dtype).itemsize
    tm_hint = min(tile_m, 512)

    if tile_h is not None:
        lanes_full = _round_up(H, 128) // 128
        lanes = min(max(1, _round_up(tile_h, 128) // 128), lanes_full)
        nh = _cdiv(lanes_full, lanes)
        lanes = _cdiv(lanes_full, nh)
        th, H_pad = lanes * 128, lanes * 128 * nh
    else:
        th, H_pad = _choose_tile_h(
            H, D_pad, R_pad, tm_hint, w_bytes, w_bytes, 4, budget)

    def padcast(a, rows, cols):
        return jnp.pad(a.astype(compute_dtype),
                       ((0, rows - a.shape[0]), (0, cols - a.shape[1])))

    return MLPParams(
        wup=padcast(w_up_deq_t, D_pad, H_pad),
        aup=padcast(w_up_lora_a, D_pad, R_pad),
        bup=padcast(w_up_lora_b, R_pad, H_pad),
        wdn=padcast(w_down_deq_t, H_pad, D_pad),
        adn=padcast(w_down_lora_a, H_pad, R_pad),
        bdn=padcast(w_down_lora_b, R_pad, D_pad),
        d=D, h=H, r=R, tile_h=th, vmem_limit=vmem_limit,
    )


# ----------------------------------------------------------------------------
# Pallas kernel: fused (quantized-base + LoRA) MLP forward, H-tiled
# ----------------------------------------------------------------------------
def mixed_mlp_kernel(
    x_ref,        # (TM, Dp)       activations (compute dtype)
    wup_ref,      # (Dp, TH)       dequantized up-proj weight tile
    aup_ref,      # (Dp, Rp)       LoRA A (up)
    bup_ref,      # (Rp, TH)       LoRA B (up) tile
    wdn_ref,      # (TH, Dp)       dequantized down-proj weight tile
    adn_ref,      # (TH, Rp)       LoRA A (down) tile
    bdn_ref,      # (Rp, Dp)       LoRA B (down)
    out_ref,      # (TM, Dp)
    *scratch,
    activation: str,
    acc_in_out: bool,
):
    if acc_in_out:
        # f32 output block is resident across the H axis: accumulate in place.
        xa_sc, dn_sc = scratch
        acc = out_ref
    else:
        xa_sc, acc_sc, dn_sc = scratch
        acc = acc_sc

    h = pl.program_id(1)
    nh = pl.num_programs(1)

    @pl.when(h == 0)
    def _init():
        # x @ A_up is H-independent: compute once per M tile, cache in the
        # compute dtype (no per-H-step cast).
        xa_sc[...] = jnp.dot(
            x_ref[...], aup_ref[...], preferred_element_type=jnp.float32
        ).astype(xa_sc.dtype)
        acc[...] = jnp.zeros(acc.shape, acc.dtype)
        dn_sc[...] = jnp.zeros(dn_sc.shape, dn_sc.dtype)

    # Up projection for this H tile: base + LoRA (B applied to cached x @ A).
    y1 = jnp.dot(x_ref[...], wup_ref[...], preferred_element_type=jnp.float32)
    y1 = y1 + jnp.dot(xa_sc[...], bup_ref[...],
                      preferred_element_type=jnp.float32)

    x2 = _apply_activation(y1, activation).astype(wdn_ref.dtype)

    # Down projection contributions of this H tile (accumulated over H tiles).
    acc[...] += jnp.dot(
        x2, wdn_ref[...], preferred_element_type=jnp.float32
    ).astype(acc.dtype)
    dn_sc[...] += jnp.dot(x2, adn_ref[...], preferred_element_type=jnp.float32)

    @pl.when(h == nh - 1)
    def _finalize():
        y2 = acc[...].astype(jnp.float32) + jnp.dot(
            dn_sc[...].astype(bdn_ref.dtype), bdn_ref[...],
            preferred_element_type=jnp.float32,
        )
        out_ref[...] = y2.astype(out_ref.dtype)


def mixed_traditional_mlp(
    x,                            # [B, S, D]
    params: MLPParams,            # from prepare_mlp_params
    activation_forward: str = "relu",
    tile_m: int = 512,
    out_dtype=None,
):
    B, S, D = x.shape
    assert D == params.d, "input feature dim does not match prepared weights"
    M = B * S
    out_dtype = x.dtype if out_dtype is None else np.dtype(out_dtype)
    compute_dtype = params.wup.dtype
    D_pad, H_pad = params.wup.shape
    R_pad = params.aup.shape[1]
    th = params.tile_h

    # M tiling: large tiles for weight reuse, but guarantee >= 2 tiles when
    # possible so the "parallel" axis can span both TensorCores (v7x).
    tm = min(tile_m, _round_up(M, 8))
    if M > 8 and _round_up(M, tm) // tm < 2:
        tm = _round_up((M + 1) // 2, 8)
    M_pad = _round_up(M, tm)

    x2d = jnp.pad(x.reshape(M, D).astype(compute_dtype),
                  ((0, M_pad - M), (0, D_pad - D)))

    acc_in_out = np.dtype(out_dtype) == np.float32
    scratch_shapes = [pltpu.VMEM((tm, R_pad), compute_dtype)]   # x @ A_up cache
    if not acc_in_out:
        scratch_shapes.append(pltpu.VMEM((tm, D_pad), jnp.float32))  # y2 acc
    scratch_shapes.append(pltpu.VMEM((tm, R_pad), jnp.float32))      # x2 @ A_dn

    grid = (M_pad // tm, H_pad // th)

    out2d = pl.pallas_call(
        functools.partial(mixed_mlp_kernel,
                          activation=activation_forward,
                          acc_in_out=acc_in_out),
        out_shape=jax.ShapeDtypeStruct((M_pad, D_pad), out_dtype),
        grid_spec=pltpu.PrefetchScalarGridSpec(
            num_scalar_prefetch=0,
            grid=grid,
            in_specs=[
                pl.BlockSpec((tm, D_pad), lambda i, h: (i, 0)),     # x
                pl.BlockSpec((D_pad, th), lambda i, h: (0, h)),     # W_up
                pl.BlockSpec((D_pad, R_pad), lambda i, h: (0, 0)),  # A_up
                pl.BlockSpec((R_pad, th), lambda i, h: (0, h)),     # B_up
                pl.BlockSpec((th, D_pad), lambda i, h: (h, 0)),     # W_down
                pl.BlockSpec((th, R_pad), lambda i, h: (h, 0)),     # A_down
                pl.BlockSpec((R_pad, D_pad), lambda i, h: (0, 0)),  # B_down
            ],
            out_specs=pl.BlockSpec((tm, D_pad), lambda i, h: (i, 0)),
            scratch_shapes=scratch_shapes,
        ),
        compiler_params=pltpu.CompilerParams(
            dimension_semantics=("parallel", "arbitrary"),
            vmem_limit_bytes=params.vmem_limit,
        ),
    )(x2d, params.wup, params.aup, params.bup, params.wdn, params.adn,
      params.bdn)

    return out2d[:M, :D].reshape(B, S, D)


# ----------------------------------------------------------------------------
# Pure-JAX reference (mimics the kernel's compute-dtype rounding points)
# ----------------------------------------------------------------------------
def mlp_reference(x, w_up_t, a_up, b_up, w_dn_t, a_dn, b_dn,
                  activation="relu", compute_dtype=jnp.bfloat16):
    f32 = jnp.float32
    cd = compute_dtype
    B, S, D = x.shape
    x2d = x.reshape(B * S, D).astype(cd).astype(f32)
    wu = w_up_t.astype(cd).astype(f32)
    au = a_up.astype(cd).astype(f32)
    bu = b_up.astype(cd).astype(f32)
    wd = w_dn_t.astype(cd).astype(f32)
    ad = a_dn.astype(cd).astype(f32)
    bd = b_dn.astype(cd).astype(f32)

    xa = (x2d @ au).astype(cd).astype(f32)        # kernel caches x@A_up in cd
    y1 = x2d @ wu + xa @ bu
    x2 = _apply_activation(y1, activation)
    x2c = x2.astype(cd).astype(f32)               # kernel feeds x2 to MXU in cd
    dn = (x2c @ ad).astype(cd).astype(f32)        # kernel casts dn acc before B_dn
    y2 = x2c @ wd + dn @ bd
    return y2.reshape(B, S, D)


# ----------------------------------------------------------------------------
# Main
# ----------------------------------------------------------------------------
if __name__ == "__main__":
    # batch, seq, model dim, intermediate dim, LoRA rank
    B, S, D, H, R = 2, 8, 32, 256, 8
    key = jax.random.PRNGKey(0)
    k_x, k_wu, k_wd, k_au, k_bu, k_ad, k_bd = jax.random.split(key, 7)

    x = jax.random.normal(k_x, (B, S, D), dtype=jnp.float32)

    # Base weights stored PyTorch-style as [out, in], then NF4 quant->dequant
    # (simulating bnb.Linear4bit) and transposed to [in, out] for the kernel.
    w_up_full = 0.05 * jax.random.normal(k_wu, (H, D), dtype=jnp.float32)
    w_down_full = 0.05 * jax.random.normal(k_wd, (D, H), dtype=jnp.float32)
    w_up_deq_t = nf4_quant_dequant(w_up_full).T        # [D, H]
    w_down_deq_t = nf4_quant_dequant(w_down_full).T    # [H, D]

    # LoRA adapters (already in .weight.T layout: [in, out])
    w_up_lora_a = 0.05 * jax.random.normal(k_au, (D, R), dtype=jnp.float32)
    w_up_lora_b = 0.05 * jax.random.normal(k_bu, (R, H), dtype=jnp.float32)
    w_down_lora_a = 0.05 * jax.random.normal(k_ad, (H, R), dtype=jnp.float32)
    w_down_lora_b = 0.05 * jax.random.normal(k_bd, (R, D), dtype=jnp.float32)

    # --- Case 1: auto tile_h (weights fully VMEM-resident), f32 in/out,
    #             relu; y2 accumulates directly into the output block. -------
    params_auto = prepare_mlp_params(
        w_up_deq_t, w_up_lora_a, w_up_lora_b,
        w_down_deq_t, w_down_lora_a, w_down_lora_b,
        compute_dtype=jnp.bfloat16)
    out1 = mixed_traditional_mlp(x, params_auto, activation_forward="relu")
    out1 = jax.block_until_ready(out1)
    ref1 = mlp_reference(x, w_up_deq_t, w_up_lora_a, w_up_lora_b,
                         w_down_deq_t, w_down_lora_a, w_down_lora_b,
                         activation="relu", compute_dtype=jnp.bfloat16)
    assert out1.shape == (B, S, D)
    assert jnp.allclose(out1, ref1, atol=1e-2, rtol=1e-2), "case1 mismatch"

    # --- Case 2: forced H tiling (exercises the cross-H accumulation path),
    #             bf16 in/out, silu; uses the f32 VMEM accumulator. ----------
    params_tiled = prepare_mlp_params(
        w_up_deq_t, w_up_lora_a, w_up_lora_b,
        w_down_deq_t, w_down_lora_a, w_down_lora_b,
        compute_dtype=jnp.bfloat16, tile_h=128)
    x_bf16 = x.astype(jnp.bfloat16)
    out2 = mixed_traditional_mlp(x_bf16, params_tiled,
                                 activation_forward="silu")
    out2 = jax.block_until_ready(out2)
    ref2 = mlp_reference(x, w_up_deq_t, w_up_lora_a, w_up_lora_b,
                         w_down_deq_t, w_down_lora_a, w_down_lora_b,
                         activation="silu", compute_dtype=jnp.bfloat16)
    assert out2.shape == (B, S, D)
    assert jnp.allclose(out2.astype(jnp.float32), ref2,
                        atol=3e-2, rtol=3e-2), "case2 mismatch"

    print("KERNEL_OK")
</pallas_src>

<mosaic_0001>
module attributes {stable_mosaic.version = 11 : i64} {
  func.func @mixed_mlp_kernel(%arg0: i32, %arg1: i32, %arg2: memref<8x128xbf16, #tpu.memory_space<vmem>>, %arg3: memref<128x256xbf16, #tpu.memory_space<vmem>>, %arg4: memref<128x128xbf16, #tpu.memory_space<vmem>>, %arg5: memref<128x256xbf16, #tpu.memory_space<vmem>>, %arg6: memref<256x128xbf16, #tpu.memory_space<vmem>>, %arg7: memref<256x128xbf16, #tpu.memory_space<vmem>>, %arg8: memref<128x128xbf16, #tpu.memory_space<vmem>>, %arg9: memref<8x128xf32, #tpu.memory_space<vmem>>, %arg10: memref<8x128xbf16, #tpu.memory_space<vmem>>, %arg11: memref<8x128xf32, #tpu.memory_space<vmem>>) attributes {dimension_semantics = [#tpu.dimension_semantics<parallel>, #tpu.dimension_semantics<arbitrary>], iteration_bounds = array<i64: 2, 1>, scalar_prefetch = 0 : i64, scratch_operands = 2 : i64, tpu.core_type = #tpu.core_type<tc>, window_params = [{transform_indices = @transform_0, window_bounds = array<i64: 8, 128>}, {transform_indices = @transform_1, window_bounds = array<i64: 128, 256>}, {pipeline_mode = #tpu.pipeline_mode<synchronous>, transform_indices = @transform_2, window_bounds = array<i64: 128, 128>}, {transform_indices = @transform_3, window_bounds = array<i64: 128, 256>}, {transform_indices = @transform_4, window_bounds = array<i64: 256, 128>}, {transform_indices = @transform_5, window_bounds = array<i64: 256, 128>}, {pipeline_mode = #tpu.pipeline_mode<synchronous>, transform_indices = @transform_6, window_bounds = array<i64: 128, 128>}, {transform_indices = @transform_7, window_bounds = array<i64: 8, 128>}]} {
    %c0_i32 = arith.constant 0 : i32
    %0 = arith.cmpi eq, %arg1, %c0_i32 : i32
    %1 = arith.extui %0 : i1 to i32
    %c0_i32_0 = arith.constant 0 : i32
    %2 = arith.cmpi ne, %1, %c0_i32_0 : i32
    scf.if %2 {
      %c0_26 = arith.constant 0 : index
      %c0_27 = arith.constant 0 : index
      %26 = vector.load %arg2[%c0_26, %c0_27] : memref<8x128xbf16, #tpu.memory_space<vmem>>, vector<8x128xbf16>
      %c0_28 = arith.constant 0 : index
      %c0_29 = arith.constant 0 : index
      %27 = vector.load %arg4[%c0_28, %c0_29] : memref<128x128xbf16, #tpu.memory_space<vmem>>, vector<128x128xbf16>
      %cst_30 = arith.constant dense<0.000000e+00> : vector<8x128xf32>
      %28 = tpu.matmul %26, %27, %cst_30 {dimension_numbers = #tpu.dot_dimension_numbers<[1], [0], [0], [1], [0, 0, 1, 1], [], []>} : vector<8x128xbf16>, vector<128x128xbf16>, vector<8x128xf32> -> vector<8x128xf32>
      %29 = arith.truncf %28 : vector<8x128xf32> to vector<8x128xbf16>
      %c0_31 = arith.constant 0 : index
      %c0_32 = arith.constant 0 : index
      %30 = vector.load %arg10[%c0_31, %c0_32] : memref<8x128xbf16, #tpu.memory_space<vmem>>, vector<8x128xbf16>
      tpu.vector_store %arg10[%c0_31, %c0_32], %29 {strides = array<i32>} : memref<8x128xbf16, #tpu.memory_space<vmem>>, vector<8x128xbf16>,
      %cst_33 = arith.constant 0.000000e+00 : f32
      %31 = vector.broadcast %cst_33 : f32 to vector<8x128xf32>
      %c0_34 = arith.constant 0 : index
      %c0_35 = arith.constant 0 : index
      %32 = vector.load %arg9[%c0_34, %c0_35] : memref<8x128xf32, #tpu.memory_space<vmem>>, vector<8x128xf32>
      tpu.vector_store %arg9[%c0_34, %c0_35], %31 {strides = array<i32>} : memref<8x128xf32, #tpu.memory_space<vmem>>, vector<8x128xf32>,
      %cst_36 = arith.constant 0.000000e+00 : f32
      %33 = vector.broadcast %cst_36 : f32 to vector<8x128xf32>
      %c0_37 = arith.constant 0 : index
      %c0_38 = arith.constant 0 : index
      %34 = vector.load %arg11[%c0_37, %c0_38] : memref<8x128xf32, #tpu.memory_space<vmem>>, vector<8x128xf32>
      tpu.vector_store %arg11[%c0_37, %c0_38], %33 {strides = array<i32>} : memref<8x128xf32, #tpu.memory_space<vmem>>, vector<8x128xf32>,
    } else {
    }
    %c0 = arith.constant 0 : index
    %c0_1 = arith.constant 0 : index
    %3 = vector.load %arg2[%c0, %c0_1] : memref<8x128xbf16, #tpu.memory_space<vmem>>, vector<8x128xbf16>
    %c0_2 = arith.constant 0 : index
    %c0_3 = arith.constant 0 : index
    %4 = vector.load %arg3[%c0_2, %c0_3] : memref<128x256xbf16, #tpu.memory_space<vmem>>, vector<128x256xbf16>
    %cst = arith.constant dense<0.000000e+00> : vector<8x256xf32>
    %5 = tpu.matmul %3, %4, %cst {dimension_numbers = #tpu.dot_dimension_numbers<[1], [0], [0], [1], [0, 0, 1, 1], [], []>} : vector<8x128xbf16>, vector<128x256xbf16>, vector<8x256xf32> -> vector<8x256xf32>
    %c0_4 = arith.constant 0 : index
    %c0_5 = arith.constant 0 : index
    %6 = vector.load %arg10[%c0_4, %c0_5] : memref<8x128xbf16, #tpu.memory_space<vmem>>, vector<8x128xbf16>
    %c0_6 = arith.constant 0 : index
    %c0_7 = arith.constant 0 : index
    %7 = vector.load %arg5[%c0_6, %c0_7] : memref<128x256xbf16, #tpu.memory_space<vmem>>, vector<128x256xbf16>
    %cst_8 = arith.constant dense<0.000000e+00> : vector<8x256xf32>
    %8 = tpu.matmul %6, %7, %cst_8 {dimension_numbers = #tpu.dot_dimension_numbers<[1], [0], [0], [1], [0, 0, 1, 1], [], []>} : vector<8x128xbf16>, vector<128x256xbf16>, vector<8x256xf32> -> vector<8x256xf32>
    %9 = arith.addf %5, %8 : vector<8x256xf32>
    %cst_9 = arith.constant 0.000000e+00 : f32
    %10 = vector.broadcast %cst_9 : f32 to vector<8x256xf32>
    %11 = arith.maximumf %9, %10 : vector<8x256xf32>
    %12 = arith.truncf %11 : vector<8x256xf32> to vector<8x256xbf16>
    %c0_10 = arith.constant 0 : index
    %c0_11 = arith.constant 0 : index
    %13 = vector.load %arg9[%c0_10, %c0_11] : memref<8x128xf32, #tpu.memory_space<vmem>>, vector<8x128xf32>
    %c0_12 = arith.constant 0 : index
    %c0_13 = arith.constant 0 : index
    %14 = vector.load %arg6[%c0_12, %c0_13] : memref<256x128xbf16, #tpu.memory_space<vmem>>, vector<256x128xbf16>
    %cst_14 = arith.constant dense<0.000000e+00> : vector<8x128xf32>
    %15 = tpu.matmul %12, %14, %cst_14 {dimension_numbers = #tpu.dot_dimension_numbers<[1], [0], [0], [1], [0, 0, 1, 1], [], []>} : vector<8x256xbf16>, vector<256x128xbf16>, vector<8x128xf32> -> vector<8x128xf32>
    %16 = arith.addf %13, %15 : vector<8x128xf32>
    %c0_15 = arith.constant 0 : index
    %c0_16 = arith.constant 0 : index
    %17 = vector.load %arg9[%c0_15, %c0_16] : memref<8x128xf32, #tpu.memory_space<vmem>>, vector<8x128xf32>
    tpu.vector_store %arg9[%c0_15, %c0_16], %16 {strides = array<i32>} : memref<8x128xf32, #tpu.memory_space<vmem>>, vector<8x128xf32>,
    %c0_17 = arith.constant 0 : index
    %c0_18 = arith.constant 0 : index
    %18 = vector.load %arg11[%c0_17, %c0_18] : memref<8x128xf32, #tpu.memory_space<vmem>>, vector<8x128xf32>
    %c0_19 = arith.constant 0 : index
    %c0_20 = arith.constant 0 : index
    %19 = vector.load %arg7[%c0_19, %c0_20] : memref<256x128xbf16, #tpu.memory_space<vmem>>, vector<256x128xbf16>
    %cst_21 = arith.constant dense<0.000000e+00> : vector<8x128xf32>
    %20 = tpu.matmul %12, %19, %cst_21 {dimension_numbers = #tpu.dot_dimension_numbers<[1], [0], [0], [1], [0, 0, 1, 1], [], []>} : vector<8x256xbf16>, vector<256x128xbf16>, vector<8x128xf32> -> vector<8x128xf32>
    %21 = arith.addf %18, %20 : vector<8x128xf32>
    %c0_22 = arith.constant 0 : index
    %c0_23 = arith.constant 0 : index
    %22 = vector.load %arg11[%c0_22, %c0_23] : memref<8x128xf32, #tpu.memory_space<vmem>>, vector<8x128xf32>
    tpu.vector_store %arg11[%c0_22, %c0_23], %21 {strides = array<i32>} : memref<8x128xf32, #tpu.memory_space<vmem>>, vector<8x128xf32>,
    %c0_i32_24 = arith.constant 0 : i32
    %23 = arith.cmpi eq, %arg1, %c0_i32_24 : i32
    %24 = arith.extui %23 : i1 to i32
    %c0_i32_25 = arith.constant 0 : i32
    %25 = arith.cmpi ne, %24, %c0_i32_25 : i32
    scf.if %25 {
      %c0_26 = arith.constant 0 : index
      %c0_27 = arith.constant 0 : index
      %26 = vector.load %arg9[%c0_26, %c0_27] : memref<8x128xf32, #tpu.memory_space<vmem>>, vector<8x128xf32>
      %c0_28 = arith.constant 0 : index
      %c0_29 = arith.constant 0 : index
      %27 = vector.load %arg11[%c0_28, %c0_29] : memref<8x128xf32, #tpu.memory_space<vmem>>, vector<8x128xf32>
      %28 = arith.truncf %27 : vector<8x128xf32> to vector<8x128xbf16>
      %c0_30 = arith.constant 0 : index
      %c0_31 = arith.constant 0 : index
      %29 = vector.load %arg8[%c0_30, %c0_31] : memref<128x128xbf16, #tpu.memory_space<vmem>>, vector<128x128xbf16>
      %cst_32 = arith.constant dense<0.000000e+00> : vector<8x128xf32>
      %30 = tpu.matmul %28, %29, %cst_32 {dimension_numbers = #tpu.dot_dimension_numbers<[1], [0], [0], [1], [0, 0, 1, 1], [], []>} : vector<8x128xbf16>, vector<128x128xbf16>, vector<8x128xf32> -> vector<8x128xf32>
      %31 = arith.addf %26, %30 : vector<8x128xf32>
      %c0_33 = arith.constant 0 : index
      %c0_34 = arith.constant 0 : index
      %32 = vector.load %arg9[%c0_33, %c0_34] : memref<8x128xf32, #tpu.memory_space<vmem>>, vector<8x128xf32>
      tpu.vector_store %arg9[%c0_33, %c0_34], %31 {strides = array<i32>} : memref<8x128xf32, #tpu.memory_space<vmem>>, vector<8x128xf32>,
    } else {
    }
    return
  }
  func.func @transform_0(%arg0: i32, %arg1: i32) -> (i32, i32) {
    %c0_i32 = arith.constant 0 : i32
    %c0_i32_0 = arith.constant 0 : i32
    return %arg0, %c0_i32 : i32, i32
  }
  func.func @transform_1(%arg0: i32, %arg1: i32) -> (i32, i32) {
    %c0_i32 = arith.constant 0 : i32
    %c0_i32_0 = arith.constant 0 : i32
    return %c0_i32, %arg1 : i32, i32
  }
  func.func @transform_2(%arg0: i32, %arg1: i32) -> (i32, i32) {
    %c0_i32 = arith.constant 0 : i32
    %c0_i32_0 = arith.constant 0 : i32
    %c0_i32_1 = arith.constant 0 : i32
    return %c0_i32, %c0_i32_0 : i32, i32
  }
  func.func @transform_3(%arg0: i32, %arg1: i32) -> (i32, i32) {
    %c0_i32 = arith.constant 0 : i32
    %c0_i32_0 = arith.constant 0 : i32
    return %c0_i32, %arg1 : i32, i32
  }
  func.func @transform_4(%arg0: i32, %arg1: i32) -> (i32, i32) {
    %c0_i32 = arith.constant 0 : i32
    %c0_i32_0 = arith.constant 0 : i32
    return %arg1, %c0_i32 : i32, i32
  }
  func.func @transform_5(%arg0: i32, %arg1: i32) -> (i32, i32) {
    %c0_i32 = arith.constant 0 : i32
    %c0_i32_0 = arith.constant 0 : i32
    return %arg1, %c0_i32 : i32, i32
  }
  func.func @transform_6(%arg0: i32, %arg1: i32) -> (i32, i32) {
    %c0_i32 = arith.constant 0 : i32
    %c0_i32_0 = arith.constant 0 : i32
    %c0_i32_1 = arith.constant 0 : i32
    return %c0_i32, %c0_i32_0 : i32, i32
  }
  func.func @transform_7(%arg0: i32, %arg1: i32) -> (i32, i32) {
    %c0_i32 = arith.constant 0 : i32
    %c0_i32_0 = arith.constant 0 : i32
    return %arg0, %c0_i32 : i32, i32
  }
}

</mosaic_0001>

<bundles_post_ra>
// kernel: tpu_custom_call.1
= control target key start
LH: loop header
LB: loop body
LE: loop exit
PB: predicated region body
PF: predicated region fallthrough
CT: control target
= control target key end

     0   :  { %s2603_s0 = inlined_call_operand.hbm [shape: bf16[16,128], index: 0, kind: input, shape index: {}]   ;;  %s2604_s1 = inlined_call_operand.hbm [shape: bf16[128,256], index: 1, kind: input, shape index: {}]   ;;  %s2605_s2 = inlined_call_operand.hbm [shape: bf16[128,128], index: 2, kind: input, shape index: {}]   ;;  %s2606_s3 = inlined_call_operand.hbm [shape: bf16[128,256], index: 3, kind: input, shape index: {}]   ;;  %s2607_s4 = inlined_call_operand.hbm [shape: bf16[256,128], index: 4, kind: input, shape index: {}]   ;;  %s2608_s5 = inlined_call_operand.hbm [shape: bf16[256,128], index: 5, kind: input, shape index: {}]   ;;  %s2609_s6 = inlined_call_operand.hbm [shape: bf16[128,128], index: 6, kind: input, shape index: {}]   ;;  %s2610_s7 = inlined_call_operand.hbm [shape: f32[16,128], index: 7, kind: output, shape index: {}]  }
   0x1   :  { %2616 = sst [smem:[#allocation22_spill]] %s2604_s1 }
   0x2   :  { %2617 = sst [smem:[#allocation23_spill]] %s2605_s2 }
   0x3   :  { %12 = vsyncpa [#allocation5], 0 }
   0x4   :  { %14 = vsyncpa [#allocation5 + $0x1], 0 }
   0x5   :  { %15 = vsyncpa [#allocation8], 0 }
   0x6   :  { %16 = vsyncpa [#allocation11], 0 }
   0x7   :  { %17 = vsyncpa [#allocation14], 0 }
   0x8   :  { %18 = vsyncpa [#allocation6], 0 }
   0x9   :  { %20 = vsyncpa [#allocation6 + $0x1], 0  ;;  %s2220_s24 = smov 0   ;;  %s2222_s25 = smov 0  }
   0xa   :  { %s2224_s26 = smov 0   ;;  %s2226_s27 = smov 0  }
   0xb   :  { %s2228_s28 = smov 0   ;;  %s2230_s29 = smov 0  }
   0xc LB: > { %s2611_s30 = sadd.s32 4294967295, %s2163_s29   ;;  %p1436_p0 = scmp.ge.s32.totalorder %s2163_s29, 1  ;;  %s2163_s29 = sphi %s2230_s29, %s26_s29   ;;  %s2159_s28 = sphi %s2228_s28, %s2640_s28   ;;  %s2155_s27 = sphi %s2226_s27, %s2639_s27   ;;  %s2151_s26 = sphi %s2224_s26, %s2638_s26   ;;  %s2147_s25 = sphi %s2222_s25, %s2637_s25   ;;  %s2143_s24 = sphi %s2220_s24, %s2636_s24  }
   0xd   : > { %p2254_p1 = scmp.eq.s32.totalorder %s2611_s30, 0  ;;  %p241_p2 = scmp.lt.s32.totalorder %s2163_s29, 3 }
   0xe   : > { %s2165_s10 = smov [#allocation7]   ;;  %s2166_s13 = smov [#allocation10]  }
   0xf   : > { %s2618_s8 = scalar_select %p2254_p1, 1, 0 }
  0x10   : > { %p2259_p3 = pnand %p1436_p0, %p241_p2  ;;  %s256_s11 = sshll.u32 %s2165_s10, 4  ;;  %s2263_s11 = int_to_ptr.vmem [resolvable:$true] %s256_s11 }
  0x11   : > { %s285_s14 = sshll.u32 %s2166_s13, 4  ;;  %s2621_s1 = sld [smem:[#allocation22_spill]]  ;;  %s2274_s14 = int_to_ptr.vmem [resolvable:$true] %s285_s14 }
  0x12   : > { %s2619_s9 = scalar_select %p2259_p3, 1, 0 }
  0x13   : > { %p1673_p4 = pneg %p2259_p3 }
  0x15   : > { %p2270_p6 = pnand %p1673_p4, %p2254_p1 }
  0x17   : > { %s1871_s17 = scalar_lea.hbm %s2621_s1, 2048  ;;  %p2284_p8 = pneg %p2270_p6 }
  0x18   : > { %p1872_p7 = scmp.ne.s32.totalorder %s2621_s1, %s1871_s17  ;;  %p1878_p11 = scmp.lt.u32.totalorder %s1871_s17, %s2621_s1 }
  0x1a   : > { %p1874_p9 = pnand %p2284_p8, %p1872_p7 }
  0x1c   : > { %p1875_p10 = pneg %p1874_p9 }
  0x1e   : > { %p1880_p12 = pnand %p1878_p11, %p1875_p10 }
  0x20   : > { %1883 = shalt.err (!%p1880_p12)
}
  0x21   : > { %s1884_s23 = scalar_lea.vmem %s2263_s11, 2048  ;;  %p1892_p4 = scmp.lt.s32.totalorder %s2263_s11, %s2263_s11 }
  0x22   : > { %p1885_p13 = scmp.ne.s32.totalorder %s2263_s11, %s1884_s23  ;;  %p1893_p5 = scmp.lt.s32.totalorder %s1884_s23, %s1884_s23 }
  0x24   : > { %p1887_p0 = pnand %p1885_p13, %p2284_p8  ;;  %p1894_p7 = por %p1893_p5, %p1892_p4 }
  0x26   : > { %p1888_p2 = pneg %p1887_p0 }
  0x28   : > { %p1895_p9 = pnand %p1894_p7, %p1888_p2 }
  0x2a   : > { %1898 = shalt.err (!%p1895_p9)
}
  0x2b   : > { %s2167_s10 = smov 128   ;;  %s2168_s13 = smov 8  }
  0x2c   : > { %1676 = dma.hbm_to_vmem [thread:$0]  (!%p2270_p6), %s2621_s1, 2048, %s2263_s11, [#allocation8], %s2167_s10, %s2167_s10, %s2168_s13  }
  0x2d   : > { %s1899_s19 = scalar_lea.hbm %s2606_s3, 2048 }
  0x2e   : > { %p1900_p5 = scmp.ne.s32.totalorder %s2606_s3, %s1899_s19  ;;  %p1906_p12 = scmp.lt.u32.totalorder %s1899_s19, %s2606_s3 }
  0x30   : > { %p1902_p10 = pnand %p1900_p5, %p2284_p8 }
  0x32   : > { %p1903_p11 = pneg %p1902_p10 }
  0x34   : > { %p1908_p13 = pnand %p1906_p12, %p1903_p11 }
  0x36   : > { %1911 = shalt.err (!%p1908_p13)
}
  0x37   : > { %s1912_s11 = scalar_lea.vmem %s2274_s14, 2048  ;;  %p1920_p7 = scmp.lt.s32.totalorder %s2274_s14, %s2274_s14 }
  0x38   : > { %p1913_p0 = scmp.ne.s32.totalorder %s2274_s14, %s1912_s11  ;;  %p1921_p9 = scmp.lt.s32.totalorder %s1912_s11, %s1912_s11 }
  0x3a   : > { %p1915_p2 = pnand %p1913_p0, %p2284_p8  ;;  %p1922_p5 = por %p1921_p9, %p1920_p7 }
  0x3c   : > { %p1916_p4 = pneg %p1915_p2 }
  0x3e   : > { %p1923_p10 = pnand %p1922_p5, %p1916_p4 }
  0x40   : > { %1926 = shalt.err (!%p1923_p10)
}
  0x41   : > { %1682 = dma.hbm_to_vmem [thread:$0]  (!%p2270_p6), %s2606_s3, 2048, %s2274_s14, [#allocation11], %s2167_s10, %s2167_s10, %s2168_s13  }
  0x42   : > { %s2169_s16 = smov [#allocation13]   ;;  %s2170_s18 = smov [#allocation9]  }
  0x43   : > { %s317_s17 = sshll.u32 %s2169_s16, 4  ;;  %s269_s19 = sshll.u32 %s2170_s18, 4  ;;  %s318_s17 = int_to_ptr.vmem [resolvable:$true] %s317_s17  ;;  %s2328_s19 = int_to_ptr.vmem [resolvable:$true] %s269_s19 }
  0x44   : > { %s1927_s23 = scalar_lea.hbm %s2608_s5, 2048 }
  0x45   : > { %p1928_p11 = scmp.ne.s32.totalorder %s2608_s5, %s1927_s23  ;;  %p1934_p0 = scmp.lt.u32.totalorder %s1927_s23, %s2608_s5 }
  0x47   : > { %p1930_p12 = pnand %p1928_p11, %p2284_p8 }
  0x49   : > { %p1931_p13 = pneg %p1930_p12 }
  0x4b   : > { %p1936_p2 = pnand %p1934_p0, %p1931_p13 }
  0x4d   : > { %1939 = shalt.err (!%p1936_p2)
}
  0x4e   : > { %s1940_s10 = scalar_lea.vmem %s318_s17, 2048  ;;  %p1948_p5 = scmp.lt.s32.totalorder %s318_s17, %s318_s17 }
  0x4f   : > { %p1941_p4 = scmp.ne.s32.totalorder %s318_s17, %s1940_s10  ;;  %p1949_p10 = scmp.lt.s32.totalorder %s1940_s10, %s1940_s10 }
  0x51   : > { %p1943_p7 = pnand %p1941_p4, %p2284_p8  ;;  %p1950_p3 = por %p1949_p10, %p1948_p5 }
  0x53   : > { %p1944_p9 = pneg %p1943_p7 }
  0x55   : > { %p1951_p1 = pnand %p1950_p3, %p1944_p9 }
  0x57   : > { %1954 = shalt.err (!%p1951_p1)
}
  0x58   : > { %s2171_s1 = smov 64   ;;  %s2172_s13 = smov 4  }
  0x59   : > { %1688 = dma.hbm_to_vmem [thread:$0]  (!%p2270_p6), %s2608_s5, 2048, %s318_s17, [#allocation14], %s2171_s1, %s2171_s1, %s2172_s13  }
  0x5a   : > { %s2623_s2 = sld [smem:[#allocation23_spill]] }
  0x60   : > { %s1955_s22 = scalar_lea.hbm %s2623_s2, 1024 }
  0x61   : > { %p1956_p1 = scmp.ne.s32.totalorder %s2623_s2, %s1955_s22  ;;  %p1962_p12 = scmp.lt.u32.totalorder %s1955_s22, %s2623_s2 }
  0x63   : > { %p1958_p3 = pnand %p1956_p1, %p2284_p8 }
  0x65   : > { %p1959_p11 = pneg %p1958_p3 }
  0x67   : > { %p1964_p13 = pnand %p1962_p12, %p1959_p11 }
  0x69   : > { %1967 = shalt.err (!%p1964_p13)
}
  0x6a   : > { %s1968_s17 = scalar_lea.vmem %s2328_s19, 1024  ;;  %p1976_p7 = scmp.lt.s32.totalorder %s2328_s19, %s2328_s19 }
  0x6b   : > { %p1969_p0 = scmp.ne.s32.totalorder %s2328_s19, %s1968_s17  ;;  %p1977_p9 = scmp.lt.s32.totalorder %s1968_s17, %s1968_s17 }
  0x6d   : > { %p1971_p2 = pnand %p1969_p0, %p2284_p8  ;;  %p1978_p5 = por %p1977_p9, %p1976_p7 }
  0x6f   : > { %p1972_p4 = pneg %p1971_p2 }
  0x71   : > { %p1979_p10 = pnand %p1978_p5, %p1972_p4 }
  0x73   : > { %1982 = shalt.err (!%p1979_p10)
}
  0x74   : > { %1679 = dma.hbm_to_vmem [thread:$0]  (!%p2270_p6), %s2623_s2, 1024, %s2328_s19, [#allocation8], %s2171_s1, %s2171_s1, %s2172_s13  }
  0x75   : > { %s2173_s16 = smov [#allocation12]   ;;  %s2174_s21 = smov [#allocation15]  }
  0x76   : > { %s301_s18 = sshll.u32 %s2173_s16, 4  ;;  %s330_s22 = sshll.u32 %s2174_s21, 4  ;;  %s302_s18 = int_to_ptr.vmem [resolvable:$true] %s301_s18  ;;  %s2377_s22 = int_to_ptr.vmem [resolvable:$true] %s330_s22 }
  0x77   : > { %s1983_s30 = scalar_lea.hbm %s2607_s4, 2048 }
  0x78   : > { %p1984_p1 = scmp.ne.s32.totalorder %s2607_s4, %s1983_s30  ;;  %p1990_p12 = scmp.lt.u32.totalorder %s1983_s30, %s2607_s4 }
  0x7a   : > { %p1986_p3 = pnand %p1984_p1, %p2284_p8 }
  0x7c   : > { %p1987_p11 = pneg %p1986_p3 }
  0x7e   : > { %p1992_p13 = pnand %p1990_p12, %p1987_p11 }
  0x80   : > { %1995 = shalt.err (!%p1992_p13)
}
  0x81   : > { %s1996_s15 = scalar_lea.vmem %s302_s18, 2048  ;;  %p2004_p7 = scmp.lt.s32.totalorder %s302_s18, %s302_s18 }
  0x82   : > { %p1997_p0 = scmp.ne.s32.totalorder %s302_s18, %s1996_s15  ;;  %p2005_p9 = scmp.lt.s32.totalorder %s1996_s15, %s1996_s15 }
  0x84   : > { %p1999_p2 = pnand %p1997_p0, %p2284_p8  ;;  %p2006_p5 = por %p2005_p9, %p2004_p7 }
  0x86   : > { %p2000_p4 = pneg %p1999_p2 }
  0x88   : > { %p2007_p10 = pnand %p2006_p5, %p2000_p4 }
  0x8a   : > { %2010 = shalt.err (!%p2007_p10)
}
  0x8b   : > { %1685 = dma.hbm_to_vmem [thread:$0]  (!%p2270_p6), %s2607_s4, 2048, %s302_s18, [#allocation11], %s2171_s1, %s2171_s1, %s2172_s13  }
  0x8c   : > { %s2011_s30 = scalar_lea.hbm %s2609_s6, 1024 }
  0x8d   : > { %p2012_p1 = scmp.ne.s32.totalorder %s2609_s6, %s2011_s30  ;;  %p2018_p12 = scmp.lt.u32.totalorder %s2011_s30, %s2609_s6 }
  0x8f   : > { %p2014_p3 = pnand %p2012_p1, %p2284_p8 }
  0x91   : > { %p2015_p11 = pneg %p2014_p3 }
  0x93   : > { %p2020_p13 = pnand %p2018_p12, %p2015_p11 }
  0x95   : > { %2023 = shalt.err (!%p2020_p13)
}
  0x96   : > { %s2024_s18 = scalar_lea.vmem %s2377_s22, 1024  ;;  %p2032_p7 = scmp.lt.s32.totalorder %s2377_s22, %s2377_s22 }
  0x97   : > { %p2025_p0 = scmp.ne.s32.totalorder %s2377_s22, %s2024_s18  ;;  %p2033_p9 = scmp.lt.s32.totalorder %s2024_s18, %s2024_s18 }
  0x99   : > { %p2027_p2 = pnand %p2025_p0, %p2284_p8  ;;  %p2034_p5 = por %p2033_p9, %p2032_p7 }
  0x9b   : > { %p2028_p4 = pneg %p2027_p2 }
  0x9d   : > { %p2035_p10 = pnand %p2034_p5, %p2028_p4 }
  0x9f   : > { %2038 = shalt.err (!%p2035_p10)
}
  0xa0   : > { %1691 = dma.hbm_to_vmem [thread:$0]  (!%p2270_p6), %s2609_s6, 1024, %s2377_s22, [#allocation14], %s2171_s1, %s2171_s1, %s2172_s13  }
  0xa1   : > { %s1435_s12 = sadd.s32 4294967294, %s2163_s29   ;;  %s38_s20 = sadd.s32 1, %s2159_s28 }
  0xa2   : > { %p40_p8 = scmp.ge.s32.totalorder %s38_s20, 2  ;;  %s45_s21 = sadd.s32 1, %s2151_s26 }
  0xa3   : > { %p52_p1 = scmp.ne.s32.totalorder %s2151_s26, %s2147_s25  ;;  %p53_p3 = scmp.eq.s32.totalorder %s2163_s29, 0 }
  0xa4   : > { %s2642_s20 = smov (%p40_p8, %s38_s20), 0  ;;  %p58_p12 = scmp.ne.s32.totalorder %s2147_s25, %s2143_s24 }
  0xa5   : > { %p2434_p11 = por %p53_p3, %p52_p1  ;;  %s42_s1 = ssub.s32 %s2159_s28, %s2642_s20 }
  0xa6   : > { %s2625_s13 = sadd.s32 4294967295, %s2163_s29   ;;  %p43_p13 = scmp.eq.s32.totalorder %s42_s1, 0 }
  0xa7   : > { %p228_p6 = scmp.eq.s32.totalorder %s2625_s13, 1  ;;  %p2626_p0 = scmp.ne.s32.totalorder %s2618_s8, 0 }
  0xa8   : > { %p234_p7 = scmp.eq.s32.totalorder %s1435_s12, 1  ;;  %p1706_p5 = scmp.lt.s32.totalorder %s2163_s29, 2 }
  0xa9   : > { %p2446_p2 = por %p2626_p0, %p58_p12  ;;  %p2450_p4 = por %p228_p6, %p52_p1 }
  0xaa   : > { %s2455_s30 = scalar_select %p43_p13, %s2151_s26, %s45_s21  }
  0xab   : > { %s2628_s11 = scalar_select %p2450_p4, 1, 0 }
  0xac   : > { %p2457_p9 = por %p234_p7, %p58_p12  ;;  %s344_s17 = sand.u32 1, %s2151_s26  }
  0xad   : > { %s1445_s10 = sshll.u32 %s2159_s28, 6  ;;  %s1444_s19 = sshll.u32 %s344_s17, 2 }
  0xae   : > { %s2629_s14 = scalar_select %p2457_p9, 1, 0 }
  0xaf   : > { %s2467_s16 = scalar_lea.hbm %s2603_s0, %s1445_s10  ;;  %s348_s12 = scalar_lea.vmem [#allocation4], %s1444_s19 }
  0xb0   : > { %s355_s21 = sshll.u32 %s348_s12, 4  ;;  %p2471_p10 = pnand %p1706_p5, %p2434_p11  ;;  %s2475_s21 = int_to_ptr.vmem [resolvable:$true] %s355_s21 }
  0xb1   : > { %s345_s13 = scalar_lea.sflag [#allocation5], %s344_s17  ;;  %s2039_s2 = scalar_lea.hbm %s2467_s16, 64 }
  0xb2   : > { %p2040_p8 = scmp.ne.s32.totalorder %s2467_s16, %s2039_s2  ;;  %p2041_p1 = pneg %p2471_p10 }
  0xb3   : > { %s2044_s23 = scalar_lea.hbm %s2603_s0, 128  ;;  %p2045_p11 = scmp.lt.u32.totalorder %s2467_s16, %s2603_s0 }
  0xb4   : > { %p2042_p3 = pnand %p2041_p1, %p2040_p8  ;;  %p2046_p6 = scmp.lt.u32.totalorder %s2044_s23, %s2039_s2 }
  0xb5   : > { %p2048_p0 = scmp.lt.u32.totalorder %s2039_s2, %s2467_s16 }
  0xb6   : > { %p2043_p12 = pneg %p2042_p3  ;;  %p2047_p13 = por %p2046_p6, %p2045_p11 }
  0xb8   : > { %p2049_p7 = por %p2048_p0, %p2047_p13 }
  0xba   : > { %p2050_p5 = pnand %p2049_p7, %p2043_p12 }
  0xbc   : > { %2053 = shalt.err (!%p2050_p5)
}
  0xbd   : > { %s2054_s17 = scalar_lea.vmem %s2475_s21, 64  ;;  %s2175_s12 = smov [#allocation4]  }
  0xbe   : > { %p2055_p8 = scmp.ne.s32.totalorder %s2475_s21, %s2054_s17  ;;  %s2059_s10 = sshll.u32 %s2175_s12, 4  ;;  %s2060_s10 = int_to_ptr.vmem [resolvable:$false] %s2059_s10 }
  0xbf   : > { %s2061_s19 = scalar_lea.vmem %s2060_s10, 128  ;;  %p2062_p4 = scmp.lt.s32.totalorder %s2475_s21, %s2060_s10 }
  0xc0   : > { %p2057_p3 = pnand %p2055_p8, %p2041_p1  ;;  %p2063_p11 = scmp.lt.s32.totalorder %s2061_s19, %s2054_s17 }
  0xc2   : > { %p2058_p9 = pneg %p2057_p3  ;;  %p2064_p6 = por %p2063_p11, %p2062_p4 }
  0xc4   : > { %p2065_p13 = pnand %p2064_p6, %p2058_p9 }
  0xc6   : > { %2068 = shalt.err (!%p2065_p13)
}
  0xc7   : > { %1695 = dma.hbm_to_vmem [thread:$0]  (!%p2471_p10), %s2467_s16, 64, %s2475_s21, %s345_s13  }
  0xc8   : > { %p2631_p12 = scmp.ne.s32.totalorder %s2619_s9, 0 }
  0xc9   : > { %s2505_s2 = sand.u32 (!%p2631_p12), 1, %s2147_s25  }
  0xca   : > { %364 = sbr.rel (%p2631_p12) target bundleno = 1199 (0x4af), region = 48  ;;  %s1447_s23 = sshll.u32 (!%p2631_p12), %s2505_s2, 2 }
  0xcb   : > { %s367_s18 = scalar_lea.sflag (!%p2631_p12), [#allocation5], %s2505_s2  ;;  %s2509_s15 = scalar_lea.vmem (!%p2631_p12), [#allocation4], %s1447_s23 }
  0xd1   : > { %2122 = dma.done.wait (%p2446_p2), %s367_s18, 64  }
  0xd2   : > { %2124 = vsyncadd (%p2446_p2), %s367_s18, 4294967232  ;;  %p2632_p4 = scmp.ne.s32.totalorder %s2618_s8, 0 }
  0xd4   : > { %2126 = dma.done.wait (%p2632_p4), [#allocation8], 3072  }
  0xd5   : > { %2128 = vsyncadd (%p2632_p4), [#allocation8], 4294964224 }
  0xd6   : > { %2130 = dma.done.wait (%p2632_p4), [#allocation11], 4096  }
  0xd7   : > { %2132 = vsyncadd (%p2632_p4), [#allocation11], 4294963200 }
  0xd8   : > { %2134 = dma.done.wait (%p2632_p4), [#allocation14], 3072  }
  0xd9   : > { %2136 = vsyncadd (%p2632_p4), [#allocation14], 4294964224  ;;  %v2176_v0 = vmov 0.0   ;;  %vm2177_vm0 = vmmov 0   ;;  %v1775_v1 = vld [vmem:[#allocation9] sm:$0xff]   ;;  %v1776_v2 = vld [vmem:[#allocation9 + $0x8] sm:$0xff]  }
  0xda   : > { %1601 = vmatprep.subr.bf16.mxu0 %v2176_v0  ;;  %1617 = vmatprep.mubr.msk.bf16.mxu0 %vm2177_vm0, %v2176_v0  ;;  %v1777_v3 = vld [vmem:[#allocation9 + $0x10] sm:$0xff]   ;;  %v1783_v4 = vld [vmem:[#allocation10 + $0x4] ss:$8 sps:$4 sm:$0xff]   ;;  %v1785_v5 = vld [vmem:[#allocation10] ss:$8 sps:$4 sm:$0xff]   ;;  %v2178_v26 = vmov 0  }
  0xdb   : > { %1602 = vmatpush3.bf16.msra.mxu0 %v1775_v1  ;;  %v1778_v6 = vld [vmem:[#allocation9 + $0x18] sm:$0xff]   ;;  %657 = vmatprep.subr.bf16.mxu1 %v1783_v4  ;;  %v1789_v9 = vld [vmem:[#allocation10 + $0x24] ss:$8 sps:$4 sm:$0xff]   ;;  %v1791_v11 = vld [vmem:[#allocation10 + $0x20] ss:$8 sps:$4 sm:$0xff]   ;;  %s1454_s8 = sshll.u32 %s2505_s2, 3 }
  0xdc   : > { %1603 = vmatprep.subr.bf16.mxu0 %v2176_v0  ;;  %v1786_v7 = vld [vmem:[#allocation10 + $0x14] ss:$8 sps:$4 sm:$0xff]   ;;  %658 = vmatpush1.bf16.msra.mxu1 %v1785_v5  ;;  %v1788_v8 = vld [vmem:[#allocation10 + $0x10] ss:$8 sps:$4 sm:$0xff]   ;;  %v1779_v10 = vld [vmem:[#allocation9 + $0x20] sm:$0xff]   ;;  %s1536_s9 = sshll.u32 %s2155_s27, 7 }
  0xdd   : > { %659 = vmatprep.subr.bf16.mxu1 %v1786_v7  ;;  %v1780_v12 = vld [vmem:[#allocation9 + $0x28] sm:$0xff]   ;;  %v1792_v13 = vld [vmem:[#allocation10 + $0x34] ss:$8 sps:$4 sm:$0xff]   ;;  %v1794_v14 = vld [vmem:[#allocation10 + $0x30] ss:$8 sps:$4 sm:$0xff]   ;;  %689 = vmatprep.mubr.bf16.mxu1 %v2178_v26  ;;  %s424_s22 = scalar_lea.vmem [#allocation16], %s1454_s8  ;;  %s2554_s13 = scalar_lea.hbm %s2610_s7, %s1536_s9 }
  0xde   : > { %v1795_v15 = vld [vmem:[#allocation10 + $0x44] ss:$8 sps:$4 sm:$0xff]   ;;  %v1781_v16 = vld [vmem:[#allocation9 + $0x30] sm:$0xff]   ;;  %v1797_v17 = vld [vmem:[#allocation10 + $0x40] ss:$8 sps:$4 sm:$0xff]   ;;  %s1291_s16 = sshll.u32 %s424_s22, 4  ;;  %s2556_s16 = int_to_ptr.vmem [resolvable:$true] %s1291_s16 }
  0xdf   : > { %1604 = vmatpush3.bf16.msra.mxu0 %v1776_v2  ;;  %v1798_v18 = vld [vmem:[#allocation10 + $0x54] ss:$8 sps:$4 sm:$0xff]   ;;  %v1800_v20 = vld [vmem:[#allocation10 + $0x50] ss:$8 sps:$4 sm:$0xff]   ;;  %v1801_v22 = vld [vmem:[#allocation10 + $0x64] ss:$8 sps:$4 sm:$0xff]  }
  0xe0   : > { %1605 = vmatprep.subr.bf16.mxu0 %v2176_v0  ;;  %660 = vmatpush1.bf16.msra.mxu1 %v1788_v8  ;;  %v1782_v19 = vld [vmem:[#allocation9 + $0x38] sm:$0xff]   ;;  %v1803_v23 = vld [vmem:[#allocation10 + $0x60] ss:$8 sps:$4 sm:$0xff]   ;;  %v1809_v27 = vld [vmem:[#allocation7 + $0x4] ss:$8 sps:$4 sm:$0xff]   ;;  %s1278_s17 = scalar_lea.sflag [#allocation6], %s2505_s2 }
  0xe1   : > { %661 = vmatprep.subr.bf16.mxu1 %v1789_v9  ;;  %v434_v21 = vld [vmem:[%s2509_s15] sm:$0xf]  ;;  %v1831_v28 = vld [vmem:[#allocation12 + $0x40] sm:$0xff]   ;;  %v1833_v30 = vld [vmem:[#allocation12 + $0x48] sm:$0xff]   ;;  %s2069_s27 = scalar_lea.vmem %s2556_s16, 128  ;;  %p2633_p9 = scmp.ne.s32.totalorder %s2628_s11, 0 }
  0xe2   : > { %v1804_v24 = vld [vmem:[#allocation10 + $0x74] ss:$8 sps:$4 sm:$0xff]   ;;  %v1806_v25 = vld [vmem:[#allocation10 + $0x70] ss:$8 sps:$4 sm:$0xff]   ;;  %v1832_v29 = vld [vmem:[#allocation12] sm:$0xff]   ;;  %p2070_p2 = scmp.ne.s32.totalorder %s2556_s16, %s2069_s27  ;;  %s2179_s12 = smov [#allocation16]  }
  0xe3   : > { %1606 = vmatpush3.bf16.msra.mxu0 %v1777_v3  ;;  %v1834_v31 = vld [vmem:[#allocation12 + $0x8] sm:$0xff]   ;;  %v1835_v32 = vld [vmem:[#allocation12 + $0x50] sm:$0xff]   ;;  %v1837_v34 = vld [vmem:[#allocation12 + $0x58] sm:$0xff]   ;;  %s2073_s10 = sshll.u32 %s2179_s12, 4  ;;  %s2074_s10 = int_to_ptr.vmem [resolvable:$false] %s2073_s10 }
  0xe4   : > { %1607 = vmatprep.subr.bf16.mxu0 %v2176_v0  ;;  %662 = vmatpush1.bf16.msra.mxu1 %v1791_v11  ;;  %v1836_v33 = vld [vmem:[#allocation12 + $0x10] sm:$0xff]   ;;  %v1838_v35 = vld [vmem:[#allocation12 + $0x18] sm:$0xff]   ;;  %v1839_v36 = vld [vmem:[#allocation12 + $0x60] sm:$0xff]   ;;  %p2071_p10 = pnand %p2070_p2, %p2633_p9  ;;  %s2075_s19 = scalar_lea.vmem %s2074_s10, 256 }
  0xe5   : > { %663 = vmatprep.subr.bf16.mxu1 %v1792_v13  ;;  %v1840_v37 = vld [vmem:[#allocation12 + $0x20] sm:$0xff]   ;;  %v1841_v38 = vld [vmem:[#allocation12 + $0x68] sm:$0xff]   ;;  %v1843_v40 = vld [vmem:[#allocation12 + $0x70] sm:$0xff]   ;;  %p2076_p0 = scmp.lt.s32.totalorder %s2556_s16, %s2074_s10  ;;  %p2077_p7 = scmp.lt.s32.totalorder %s2075_s19, %s2069_s27 }
  0xe6   : > { %v1842_v39 = vld [vmem:[#allocation12 + $0x28] sm:$0xff]   ;;  %v1844_v41 = vld [vmem:[#allocation12 + $0x30] sm:$0xff]   ;;  %v543_v63 = vld [vmem:[%s2509_s15] sm:$0xf]  ;;  %p2072_p1 = pneg %p2071_p10 }
  0xe7   : > { %1608 = vmatpush3.bf16.msra.mxu0 %v1778_v6  ;;  %v1807_v47 = vld [vmem:[#allocation7] ss:$8 sps:$4 sm:$0xff]   ;;  %v1812_v48 = vld [vmem:[#allocation7 + $0x14] ss:$8 sps:$4 sm:$0xff]   ;;  %v1810_v50 = vld [vmem:[#allocation7 + $0x10] ss:$8 sps:$4 sm:$0xff]   ;;  %p2078_p5 = por %p2077_p7, %p2076_p0 }
  0xe8   : > { %1609 = vmatprep.subr.bf16.mxu0 %v2176_v0  ;;  %664 = vmatpush1.bf16.msra.mxu1 %v1794_v14  ;;  %v1815_v51 = vld [vmem:[#allocation7 + $0x24] ss:$8 sps:$4 sm:$0xff]   ;;  %v1813_v52 = vld [vmem:[#allocation7 + $0x20] ss:$8 sps:$4 sm:$0xff]   ;;  %v1818_v53 = vld [vmem:[#allocation7 + $0x34] ss:$8 sps:$4 sm:$0xff]  }
  0xe9   : > { %665 = vmatprep.subr.bf16.mxu1 %v1795_v15  ;;  %v1816_v54 = vld [vmem:[#allocation7 + $0x30] ss:$8 sps:$4 sm:$0xff]   ;;  %v1821_v55 = vld [vmem:[#allocation7 + $0x44] ss:$8 sps:$4 sm:$0xff]   ;;  %v1819_v56 = vld [vmem:[#allocation7 + $0x40] ss:$8 sps:$4 sm:$0xff]   ;;  %p2079_p8 = pnand %p2078_p5, %p2072_p1 }
  0xea   : > { %v1824_v57 = vld [vmem:[#allocation7 + $0x54] ss:$8 sps:$4 sm:$0xff]   ;;  %v1822_v58 = vld [vmem:[#allocation7 + $0x50] ss:$8 sps:$4 sm:$0xff]   ;;  %v1827_v59 = vld [vmem:[#allocation7 + $0x64] ss:$8 sps:$4 sm:$0xff]  }
  0xeb   : > { %1610 = vmatpush3.bf16.msra.mxu0 %v1779_v10  ;;  %v1825_v60 = vld [vmem:[#allocation7 + $0x60] ss:$8 sps:$4 sm:$0xff]   ;;  %v1830_v61 = vld [vmem:[#allocation7 + $0x74] ss:$8 sps:$4 sm:$0xff]   ;;  %v1828_v62 = vld [vmem:[#allocation7 + $0x70] ss:$8 sps:$4 sm:$0xff]  }
  0xec   : > { %1611 = vmatprep.subr.bf16.mxu0 %v2176_v0  ;;  %666 = vmatpush1.bf16.msra.mxu1 %v1797_v17  ;;  %v1845_v1 = vld [vmem:[#allocation12 + $0x78] sm:$0xff]   ;;  %v1847_v3 = vld [vmem:[#allocation13 + $0x40] sm:$0xff]   ;;  %v1849_v13 = vld [vmem:[#allocation13 + $0x48] sm:$0xff]  }
  0xed   : > { %667 = vmatprep.subr.bf16.mxu1 %v1798_v18  ;;  %v1846_v2 = vld [vmem:[#allocation12 + $0x38] sm:$0xff]   ;;  %v1848_v11 = vld [vmem:[#allocation13] sm:$0xff]   ;;  %v1850_v14 = vld [vmem:[#allocation13 + $0x8] sm:$0xff]  }
  0xee   : > { %v1851_v15 = vld [vmem:[#allocation13 + $0x50] sm:$0xff]   ;;  %v1853_v17 = vld [vmem:[#allocation13 + $0x58] sm:$0xff]  }
  0xef   : > { %1612 = vmatpush3.bf16.msra.mxu0 %v1780_v12  ;;  %v1854_v18 = vld [vmem:[#allocation13 + $0x18] sm:$0xff]  }
  0xf0   : > { %1613 = vmatprep.subr.bf16.mxu0 %v2176_v0  ;;  %668 = vmatpush1.bf16.msra.mxu1 %v1800_v20  ;;  %v1856_v20 = vld [vmem:[#allocation13 + $0x20] sm:$0xff]  }
  0xf1   : > { %669 = vmatprep.subr.bf16.mxu1 %v1801_v22  ;;  %v1858_v22 = vld [vmem:[#allocation13 + $0x28] sm:$0xff]  }
  0xf3   : > { %1614 = vmatpush3.bf16.msra.mxu0 %v1781_v16  ;;  %v1852_v16 = vld [vmem:[#allocation13 + $0x10] sm:$0xff]  }
  0xf4   : > { %1615 = vmatprep.subr.bf16.mxu0 %v2176_v0  ;;  %670 = vmatpush1.bf16.msra.mxu1 %v1803_v23  ;;  %v1859_v23 = vld [vmem:[#allocation13 + $0x70] sm:$0xff]  }
  0xf5   : > { %671 = vmatprep.subr.bf16.mxu1 %v1804_v24  ;;  %v1860_v24 = vld [vmem:[#allocation13 + $0x30] sm:$0xff]  }
  0xf7   : > { %1616 = vmatpush3.bf16.msra.mxu0 %v1782_v19  ;;  %v1855_v19 = vld [vmem:[#allocation13 + $0x60] sm:$0xff]  }
  0xf8   : > { %672 = vmatpush1.bf16.msra.mxu1 %v1806_v25  ;;  %1548 = vmatprep.subr.bf16.mxu0 %v1831_v28  ;;  %v1861_v25 = vld [vmem:[#allocation13 + $0x78] sm:$0xff]   ;;  %v1864_v28 = vld [vmem:[#allocation15 + $0x8] sm:$0xff]  }
  0xf9   : > { %778 = vmatprep.subr.bf16.mxu1 %v1809_v27  ;;  %v1863_v27 = vld [vmem:[#allocation15] sm:$0xff]  }
  0xfa   : > { %1618 = vmatmul.mubr.bf16.vlgmr.msra.gmra.mrb[0].mxu0 %v434_v21  ;;  %v1857_v21 = vld [vmem:[#allocation13 + $0x68] sm:$0xff]  }
  0xfb   : > { %1549 = vmatpush3.bf16.msra.mxu0 %v1832_v29  ;;  %v1865_v29 = vld [vmem:[#allocation15 + $0x10] sm:$0xff]  }
  0xfc   : > { %1550 = vmatprep.subr.bf16.mxu0 %v1833_v30  ;;  %v1866_v30 = vld [vmem:[#allocation15 + $0x18] sm:$0xff]  }
  0xff   : > { %1551 = vmatpush3.bf16.msra.mxu0 %v1834_v31  ;;  %v1867_v31 = vld [vmem:[#allocation15 + $0x20] sm:$0xff]  }
 0x100   : > { %1552 = vmatprep.subr.bf16.mxu0 %v1835_v32  ;;  %v1868_v32 = vld [vmem:[#allocation15 + $0x28] sm:$0xff]  }
 0x103   : > { %1553 = vmatpush3.bf16.msra.mxu0 %v1836_v33  ;;  %v1869_v33 = vld [vmem:[#allocation15 + $0x30] sm:$0xff]  }
 0x104   : > { %1554 = vmatprep.subr.bf16.mxu0 %v1837_v34  ;;  %v1870_v34 = vld [vmem:[#allocation15 + $0x38] sm:$0xff]  }
 0x107   : > { %1555 = vmatpush3.bf16.msra.mxu0 %v1838_v35 }
 0x108   : > { %1556 = vmatprep.subr.bf16.mxu0 %v1839_v36 }
 0x10b   : > { %1557 = vmatpush3.bf16.msra.mxu0 %v1840_v37 }
 0x10c   : > { %1558 = vmatprep.subr.bf16.mxu0 %v1841_v38 }
 0x10f   : > { %1559 = vmatpush3.bf16.msra.mxu0 %v1842_v39 }
 0x110   : > { %1560 = vmatprep.subr.bf16.mxu0 %v1843_v40 }
 0x113   : > { %1561 = vmatpush3.bf16.msra.mxu0 %v1844_v41 }
 0x114   : > { %1562 = vmatprep.subr.bf16.mxu0 %v1845_v1 }
 0x117   : > { %1563 = vmatpush3.bf16.msra.mxu0 %v1846_v2 }
 0x118   : > { %1570 = vmatprep.subr.bf16.mxu0 %v1847_v3 }
 0x1cd   : > { %v533_v42 = vpop.f32.mrb[0].mxu0 }
 0x1ce   : > { %v539_v43 = vpack.c.bf16 %v533_v42, %v533_v42  ;;  %v1619_v44 = vpop.f32.mrb[1].mxu0 }
 0x1cf   : > { %v536_v45 = vpop.f32.mrb[2].mxu0 }
 0x1d0   : > { %540 = vst [vmem:[#allocation2] sm:$0xf] %v539_v43  ;;  %v1620_v46 = vpop.f32.mrb[3].mxu0 }
 0x1d7   : > { %v560_v49 = vld [vmem:[#allocation2] sm:$0xf] }
 0x1d8   : > { %690 = vmatmul.mubr.bf16.vlgmr.msra.gmra.mrb[0].mxu1 %v560_v49 }
 0x1d9   : > { %779 = vmatpush1.bf16.msra.mxu1 %v1807_v47  ;;  %810 = vmatprep.mubr.bf16.mxu1 %v2178_v26  ;;  %v1862_v26 = vld [vmem:[#allocation13 + $0x38] sm:$0xff]  }
 0x1da   : > { %780 = vmatprep.subr.bf16.mxu1 %v1812_v48 }
 0x1dd   : > { %781 = vmatpush1.bf16.msra.mxu1 %v1810_v50 }
 0x1de   : > { %782 = vmatprep.subr.bf16.mxu1 %v1815_v51 }
 0x1e1   : > { %783 = vmatpush1.bf16.msra.mxu1 %v1813_v52 }
 0x1e2   : > { %784 = vmatprep.subr.bf16.mxu1 %v1818_v53 }
 0x1e5   : > { %785 = vmatpush1.bf16.msra.mxu1 %v1816_v54 }
 0x1e6   : > { %786 = vmatprep.subr.bf16.mxu1 %v1821_v55 }
 0x1e9   : > { %787 = vmatpush1.bf16.msra.mxu1 %v1819_v56 }
 0x1ea   : > { %788 = vmatprep.subr.bf16.mxu1 %v1824_v57 }
 0x1ed   : > { %789 = vmatpush1.bf16.msra.mxu1 %v1822_v58 }
 0x1ee   : > { %790 = vmatprep.subr.bf16.mxu1 %v1827_v59 }
 0x1f1   : > { %791 = vmatpush1.bf16.msra.mxu1 %v1825_v60 }
 0x1f2   : > { %792 = vmatprep.subr.bf16.mxu1 %v1830_v61 }
 0x1f5   : > { %793 = vmatpush1.bf16.msra.mxu1 %v1828_v62 }
 0x1f6   : > { %1621 = vmatprep.subr.bf16.mxu1 %v2176_v0 }
 0x1f8   : > { %811 = vmatmul.mubr.bf16.vlgmr.msra.gmra.mrb[0].mxu1 %v543_v63 }
 0x1f9   : > { %1637 = vmatprep.mubr.msk.bf16.mxu1 %vm2177_vm0, %v2176_v0  ;;  %1622 = vmatpush3.bf16.msra.mxu1 %v1863_v27 }
 0x1fa   : > { %1623 = vmatprep.subr.bf16.mxu1 %v2176_v0 }
 0x1fd   : > { %1624 = vmatpush3.bf16.msra.mxu1 %v1864_v28 }
 0x1fe   : > { %1625 = vmatprep.subr.bf16.mxu1 %v2176_v0 }
 0x201   : > { %1626 = vmatpush3.bf16.msra.mxu1 %v1865_v29 }
 0x202   : > { %1627 = vmatprep.subr.bf16.mxu1 %v2176_v0 }
 0x205   : > { %1628 = vmatpush3.bf16.msra.mxu1 %v1866_v30 }
 0x206   : > { %1629 = vmatprep.subr.bf16.mxu1 %v2176_v0 }
 0x209   : > { %1630 = vmatpush3.bf16.msra.mxu1 %v1867_v31 }
 0x20a   : > { %1631 = vmatprep.subr.bf16.mxu1 %v2176_v0 }
 0x20d   : > { %1632 = vmatpush3.bf16.msra.mxu1 %v1868_v32 }
 0x20e   : > { %1633 = vmatprep.subr.bf16.mxu1 %v2176_v0 }
 0x211   : > { %1634 = vmatpush3.bf16.msra.mxu1 %v1869_v33 }
 0x212   : > { %1635 = vmatprep.subr.bf16.mxu1 %v2176_v0 }
 0x215   : > { %1636 = vmatpush3.bf16.msra.mxu1 %v1870_v34 }
 0x2cb   : > { %v812_v4 = vpop.f32.mrb[0].mxu1 }
 0x2cc   : > { %v819_v5 = vmax.f32 %v812_v4, 0.0  ;;  %v814_v6 = vpop.f32.mrb[1].mxu1 }
 0x2cd   : > { %v820_v7 = vmax.f32 %v814_v6, 0.0  ;;  %v816_v8 = vpop.f32.mrb[2].mxu1 }
 0x2ce   : > { %v817_v9 = vpop.f32.mrb[3].mxu1  ;;  %v821_v12 = vpack.c.bf16 %v819_v5, %v819_v5 }
 0x2cf   : > { %v822_v10 = vpack.c.bf16 %v820_v7, %v820_v7 }
 0x2d1   : > { %984 = vmatprep.mubr.bf16.mxu0 %v822_v10 }
 0x2d2   : > { %985 = vmatmul.mubr.bf16.vlgmr.msra.gmra.mrb[4].mxu0 %v821_v12 }
 0x2d3   : > { %1571 = vmatpush3.bf16.msra.mxu0 %v1848_v11  ;;  %1155 = vmatprep.mubr.bf16.mxu0 %v822_v10 }
 0x2d4   : > { %1572 = vmatprep.subr.bf16.mxu0 %v1849_v13 }
 0x2d7   : > { %1573 = vmatpush3.bf16.msra.mxu0 %v1850_v14 }
 0x2d8   : > { %1574 = vmatprep.subr.bf16.mxu0 %v1851_v15 }
 0x2db   : > { %1575 = vmatpush3.bf16.msra.mxu0 %v1852_v16 }
 0x2dc   : > { %1576 = vmatprep.subr.bf16.mxu0 %v1853_v17 }
 0x2df   : > { %1577 = vmatpush3.bf16.msra.mxu0 %v1854_v18 }
 0x2e0   : > { %1578 = vmatprep.subr.bf16.mxu0 %v1855_v19 }
 0x2e3   : > { %1579 = vmatpush3.bf16.msra.mxu0 %v1856_v20 }
 0x2e4   : > { %1580 = vmatprep.subr.bf16.mxu0 %v1857_v21 }
 0x2e7   : > { %1581 = vmatpush3.bf16.msra.mxu0 %v1858_v22 }
 0x2e8   : > { %1582 = vmatprep.subr.bf16.mxu0 %v1859_v23 }
 0x2eb   : > { %1583 = vmatpush3.bf16.msra.mxu0 %v1860_v24 }
 0x2ec   : > { %1584 = vmatprep.subr.bf16.mxu0 %v1861_v25 }
 0x2ef   : > { %1585 = vmatpush3.bf16.msra.mxu0 %v1862_v26 }
 0x2f2   : > { %1156 = vmatmul.mubr.bf16.vlgmr.msra.gmra.mrb[8].mxu0 %v821_v12 }
 0x3a5   : > { %v1564_v35 = vpop.f32.mrb[4].mxu0 }
 0x3a6   : > { %v1565_v36 = vpop.f32.mrb[5].mxu0 }
 0x3a7   : > { %v1566_v37 = vadd.f32 %v1565_v36, %v1564_v35  ;;  %v1567_v38 = vpop.f32.mrb[6].mxu0 }
 0x3a8   : > { %v1568_v39 = vpop.f32.mrb[7].mxu0 }
 0x3c5   : > { %v1586_v40 = vpop.f32.mrb[8].mxu0 }
 0x3c6   : > { %v1587_v41 = vpop.f32.mrb[9].mxu0 }
 0x3c7   : > { %v1588_v42 = vadd.f32 %v1587_v41, %v1586_v40  ;;  %v1589_v43 = vpop.f32.mrb[10].mxu0 }
 0x3c8   : > { %v1590_v44 = vpop.f32.mrb[11].mxu0 }
 0x3c9   : > { %v1170_v45 = vpack.c.bf16 %v1588_v42, %v1588_v42 }
 0x3cb   : > { %1638 = vmatmul.mubr.bf16.vlgmr.msra.gmra.mrb[4].mxu1 %v1170_v45 }
 0x49e   : > { %v1269_v0 = vpop.f32.mrb[4].mxu1 }
 0x49f   : > { %v1275_v46 = vadd.f32 %v1566_v37, %v1269_v0  ;;  %v1639_v47 = vpop.f32.mrb[5].mxu1 }
 0x4a0   : > { %v1272_v48 = vpop.f32.mrb[6].mxu1 }
 0x4a1   : > { %1276 = vst [vmem:[%s424_s22] sm:$0xff] %v1275_v46  ;;  %v1640_v49 = vpop.f32.mrb[7].mxu1 }
 0x4a2   : > { %2082 = shalt.err (!%p2079_p8)
}
 0x4a3   : > { %s2083_s2 = scalar_lea.hbm %s2554_s13, 128  ;;  %s2087_s15 = scalar_lea.hbm %s2610_s7, 256 }
 0x4a4   : > { %p2084_p3 = scmp.ne.s32.totalorder %s2554_s13, %s2083_s2  ;;  %p2088_p13 = scmp.lt.u32.totalorder %s2554_s13, %s2610_s7 }
 0x4a5   : > { %p2089_p12 = scmp.lt.u32.totalorder %s2087_s15, %s2083_s2  ;;  %p2091_p2 = scmp.lt.u32.totalorder %s2083_s2, %s2554_s13 }
 0x4a6   : > { %p2085_p11 = pnand %p2084_p3, %p2633_p9 }
 0x4a7   : > { %p2090_p4 = por %p2089_p12, %p2088_p13 }
 0x4a8   : > { %p2086_p6 = pneg %p2085_p11 }
 0x4a9   : > { %p2092_p10 = por %p2091_p2, %p2090_p4 }
 0x4ab   : > { %p2093_p1 = pnand %p2092_p10, %p2086_p6 }
 0x4ad   : > { %2096 = shalt.err (!%p2093_p1)
}
 0x4ae   : > { %1671 = dma.vmem_to_hbm [thread:$0]  (%p2633_p9), %s2556_s16, 128, %s2554_s13, %s1278_s17  }
 0x4af PF: > { %s1303_s22 = sand.u32 1, %s2143_s24   ;;  %p2634_p0 = scmp.ne.s32.totalorder %s2629_s14, 0 }
 0x4b0   : > { %p2635_p7 = scmp.ge.s32.totalorder %s2163_s29, 2  ;;  %s1304_s21 = scalar_lea.sflag [#allocation6], %s1303_s22 }
 0x4b2   : > { %p1697_p5 = pnand %p2635_p7, %p2634_p0 }
 0x4b4   : > { %2138 = dma.done.wait (!%p1697_p5), %s1304_s21, 128  }
 0x4b5   : > { %2140 = vsyncadd (!%p1697_p5), %s1304_s21, 4294967168  ;;  %s26_s29 = sadd.s32 1, %s2163_s29   ;;  %s2636_s24 = smov %s2147_s25 }
 0x4b6   : > { %p23_p8 = scmp.ge.s32.totalorder %s26_s29, 4   ;;  %s2637_s25 = smov %s2151_s26 }
 0x4b7   : > { %s2638_s26 = smov %s2455_s30  ;;  %s2639_s27 = smov %s2159_s28 }
 0x4b8   : > { %s2640_s28 = smov %s2642_s20  ;;  %25 = sbr.rel (!%p23_p8) target bundleno = 12 (0xc), region = 129 }
 0x4bf   :  { %1309 = vsyncpa [#allocation5], 1 }
 0x4c0   :  { %1311 = vsyncpa [#allocation5 + $0x1], 1 }
 0x4c1   :  { %1312 = vsyncpa [#allocation8], 1 }
 0x4c2   :  { %1313 = vsyncpa [#allocation11], 1 }
 0x4c3   :  { %1314 = vsyncpa [#allocation14], 1 }
 0x4c4   :  { %1315 = vsyncpa [#allocation6], 1 }
 0x4c5   :  { %1317 = vsyncpa [#allocation6 + $0x1], 1 }

</bundles_post_ra>
